<compile_context>
chip_gen: v6e
topology: v6e:2x2x1
jax: 0.10.0
libtpu: 0.0.40
codegen_flags: <defaults>
</compile_context>

<pallas_src>
import functools

import jax
import jax.numpy as jnp
from jax.experimental import pallas as pl
from jax.experimental.pallas import tpu as pltpu


def _round_up(x, m):
    return (x + m - 1) // m * m


def _mil_kernel(h_ref, w1_ref, b1_ref, w2_ref, b2_ref,
                logits_ref, yprobs_ref, pooled_ref,
                acc_ref, *, n_valid, tile_n, mask_needed):
    """One grid step: fc (Linear+ReLU) on a tile of instances, accumulate sum.

    Dropout(0.25) is identity in eval mode. The last step finishes the
    mean-pool, classifier and softmax.
    """
    i = pl.program_id(0)
    n_steps = pl.num_programs(0)

    @pl.when(i == 0)
    def _():
        acc_ref[...] = jnp.zeros_like(acc_ref)

    # fc: Linear(D -> H).  bf16 operands on the MXU, f32 accumulation;
    # bias add + ReLU in f32 on the VPU.
    z = jnp.dot(h_ref[...], w1_ref[...], preferred_element_type=jnp.float32)
    z = jnp.maximum(z + b1_ref[...], 0.0)

    if mask_needed:
        # Zero rows that came from padding (global row index >= n_valid).
        # Padding rows only exist in the last tile; the compare+select is a
        # single co-issued VPU op per vreg, negligible next to the matmul.
        row = i * tile_n + jax.lax.broadcasted_iota(jnp.int32, (tile_n, 1), 0)
        z = jnp.where(row < n_valid, z, 0.0)

    # Sublane-aligned partial sum: view (tile_n, H) as (tile_n//8, 8, H) and
    # reduce the leading axis (pure vreg adds on the VALU slot, keeping the
    # extended slot free for vmatmul pushes).
    H = acc_ref.shape[1]
    z3 = z.reshape(tile_n // 8, 8, H)
    acc_ref[...] += jnp.sum(z3, axis=0)

    @pl.when(i == n_steps - 1)
    def _():
        # Collapse the 8 accumulator sublanes once (cold path), then mean.
        pooled = jnp.sum(acc_ref[...], axis=0, keepdims=True) / jnp.float32(n_valid)
        pooled_ref[...] = pooled
        # classifier: Linear(H -> C) in f32 (tiny, runs once).
        logits = jnp.dot(pooled, w2_ref[...],
                         preferred_element_type=jnp.float32) + b2_ref[...]
        logits_ref[...] = logits
        # softmax over classes (dim=1)
        m = jnp.max(logits, axis=1, keepdims=True)
        e = jnp.exp(logits - m)
        yprobs_ref[...] = e / jnp.sum(e, axis=1, keepdims=True)


@functools.partial(jax.jit, static_argnames=("tile_n", "return_features"))
def mil_mean_pooling_forward(h, w1, b1, w2, b2, *, tile_n=None,
                             return_features=False):
    N, D = h.shape
    H = w1.shape[1]
    C = w2.shape[1]

    if tile_n is None:
        # Single grid step for small bags; 1024-row tiles for large bags
        # (1024 x 512 bf16 h-tile = 1 MiB, 2 MiB double-buffered).
        tile_n = min(_round_up(N, 16), 1024)
    assert tile_n % 16 == 0, "tile_n must be a multiple of 16 (bf16 sublane tile)"

    n_pad = _round_up(N, tile_n)

    # bf16 operands for the streamed h and the resident W1; everything else f32.
    h_bf16 = h.astype(jnp.bfloat16)
    if n_pad != N:
        h_bf16 = jnp.pad(h_bf16, ((0, n_pad - N), (0, 0)))
    w1_bf16 = w1.astype(jnp.bfloat16)
    b1f = b1.astype(jnp.float32)
    w2f = w2.astype(jnp.float32)
    b2f = b2.astype(jnp.float32)

    grid = (n_pad // tile_n,)
    kernel = functools.partial(_mil_kernel, n_valid=N, tile_n=tile_n,
                               mask_needed=(n_pad != N))

    out_shapes = (
        jax.ShapeDtypeStruct((1, C), jnp.float32),   # logits
        jax.ShapeDtypeStruct((1, C), jnp.float32),   # y_probs (softmax)
        jax.ShapeDtypeStruct((1, H), jnp.float32),   # pooled features
    )
    logits, y_probs, pooled = pl.pallas_call(
        kernel,
        out_shape=out_shapes,
        grid_spec=pltpu.PrefetchScalarGridSpec(
            num_scalar_prefetch=0,
            grid=grid,
            in_specs=[
                pl.BlockSpec((tile_n, D), lambda i: (i, 0)),   # h tile (bf16, streamed)
                pl.BlockSpec((D, H), lambda i: (0, 0)),        # W1 (bf16, resident)
                pl.BlockSpec((1, H), lambda i: (0, 0)),        # b1 (f32)
                pl.BlockSpec((H, C), lambda i: (0, 0)),        # W2 (f32)
                pl.BlockSpec((1, C), lambda i: (0, 0)),        # b2 (f32)
            ],
            out_specs=[
                pl.BlockSpec((1, C), lambda i: (0, 0)),
                pl.BlockSpec((1, C), lambda i: (0, 0)),
                pl.BlockSpec((1, H), lambda i: (0, 0)),
            ],
            scratch_shapes=[pltpu.VMEM((8, H), jnp.float32)],
        ),
        compiler_params=pltpu.CompilerParams(
            dimension_semantics=("arbitrary",)),   # reduction over instances
    )(h_bf16, w1_bf16, b1f, w2f, b2f)

    # ---- trivial glue, matches torch semantics exactly ----
    # top_k=1 over y_probs[:, 1]; the pooled tensor has a single row, so the
    # selected index is always 0 (same as torch.topk on a length-1 vector).
    top_instance_idx = jnp.argsort(-y_probs[:, 1])[:1]          # shape (1,)
    top_instance = jnp.take(logits, top_instance_idx, axis=0)   # (1, C)
    Y_hat = jnp.argmax(top_instance, axis=1, keepdims=True)     # (1, 1)
    mm = jnp.max(top_instance, axis=1, keepdims=True)
    ee = jnp.exp(top_instance - mm)
    Y_prob = ee / jnp.sum(ee, axis=1, keepdims=True)            # (1, C)

    results_dict = {}
    if return_features:
        results_dict["features"] = jnp.take(pooled, top_instance_idx, axis=0)
    return top_instance, Y_prob, Y_hat, y_probs, results_dict


def init_params(key, embed_dim=512, n_classes=2):
    """Deterministic synthetic parameters (shapes follow the torch module)."""
    hidden = embed_dim // 2
    k1, k2, k3, k4 = jax.random.split(key, 4)
    w1 = jax.random.normal(k1, (embed_dim, hidden), jnp.float32) * 0.02
    b1 = jax.random.normal(k2, (1, hidden), jnp.float32) * 0.02
    w2 = jax.random.normal(k3, (hidden, n_classes), jnp.float32) * 0.02
    b2 = jax.random.normal(k4, (1, n_classes), jnp.float32) * 0.02
    return w1, b1, w2, b2


def _reference(h, w1, b1, w2, b2):
    """Pure-JAX reference with the same bf16 operand quantization as the kernel."""
    z = jnp.dot(h.astype(jnp.bfloat16), w1.astype(jnp.bfloat16),
                preferred_element_type=jnp.float32) + b1
    z = jnp.maximum(z, 0.0)
    pooled = jnp.mean(z, axis=0, keepdims=True)
    logits = pooled @ w2 + b2
    yprobs = jax.nn.softmax(logits, axis=1)
    return logits, yprobs, pooled


if __name__ == "__main__":
    EMBED_DIM = 512     # module default
    N_CLASSES = 2
    N_INSTANCES = 64    # small bag of instances -> single grid step

    key = jax.random.PRNGKey(0)
    k_h, k_h2, k_p = jax.random.split(key, 3)
    h = jax.random.normal(k_h, (N_INSTANCES, EMBED_DIM), jnp.float32)
    w1, b1, w2, b2 = init_params(k_p, EMBED_DIM, N_CLASSES)

    top_instance, Y_prob, Y_hat, y_probs, results = mil_mean_pooling_forward(
        h, w1, b1, w2, b2, return_features=True)
    jax.block_until_ready((top_instance, Y_prob, Y_hat, y_probs,
                           results["features"]))

    # sanity checks against a pure-JAX reference (same bf16 operand cast)
    logits_ref, yprobs_ref, pooled_ref = _reference(h, w1, b1, w2, b2)
    assert jnp.allclose(top_instance, logits_ref, atol=1e-3, rtol=1e-3)
    assert jnp.allclose(y_probs, yprobs_ref, atol=1e-3, rtol=1e-3)
    assert jnp.allclose(Y_prob, yprobs_ref, atol=1e-3, rtol=1e-3)
    assert jnp.allclose(results["features"], pooled_ref, atol=1e-3, rtol=1e-3)
    assert Y_hat.shape == (1, 1)

    # ragged-N path: N=50 with tile_n=16 exercises padding mask + multi-step
    # accumulation across grid iterations.
    h2 = jax.random.normal(k_h2, (50, EMBED_DIM), jnp.float32)
    ti2, yp2_top, yhat2, yprobs2, _ = mil_mean_pooling_forward(
        h2, w1, b1, w2, b2, tile_n=16)
    jax.block_until_ready((ti2, yprobs2))
    l2_ref, yp2_ref, _ = _reference(h2, w1, b1, w2, b2)
    assert jnp.allclose(ti2, l2_ref, atol=1e-3, rtol=1e-3)
    assert jnp.allclose(yprobs2, yp2_ref, atol=1e-3, rtol=1e-3)

    print("KERNEL_OK")
</pallas_src>

<mosaic_0001>
module attributes {stable_mosaic.version = 11 : i64} {
  func.func @_mil_kernel(%arg0: i32, %arg1: memref<64x512xbf16, #tpu.memory_space<vmem>>, %arg2: memref<512x256xbf16, #tpu.memory_space<vmem>>, %arg3: memref<1x256xf32, #tpu.memory_space<vmem>>, %arg4: memref<256x2xf32, #tpu.memory_space<vmem>>, %arg5: memref<1x2xf32, #tpu.memory_space<vmem>>, %arg6: memref<1x2xf32, #tpu.memory_space<vmem>>, %arg7: memref<1x2xf32, #tpu.memory_space<vmem>>, %arg8: memref<1x256xf32, #tpu.memory_space<vmem>>, %arg9: memref<8x256xf32, #tpu.memory_space<vmem>>) attributes {dimension_semantics = [#tpu.dimension_semantics<arbitrary>], iteration_bounds = array<i64: 1>, scalar_prefetch = 0 : i64, scratch_operands = 1 : i64, tpu.core_type = #tpu.core_type<tc>, window_params = [{transform_indices = @transform_0, window_bounds = array<i64: 64, 512>}, {pipeline_mode = #tpu.pipeline_mode<synchronous>, transform_indices = @transform_1, window_bounds = array<i64: 512, 256>}, {pipeline_mode = #tpu.pipeline_mode<synchronous>, transform_indices = @transform_2, window_bounds = array<i64: 1, 256>}, {pipeline_mode = #tpu.pipeline_mode<synchronous>, transform_indices = @transform_3, window_bounds = array<i64: 256, 2>}, {pipeline_mode = #tpu.pipeline_mode<synchronous>, transform_indices = @transform_4, window_bounds = array<i64: 1, 2>}, {pipeline_mode = #tpu.pipeline_mode<synchronous>, transform_indices = @transform_5, window_bounds = array<i64: 1, 2>}, {pipeline_mode = #tpu.pipeline_mode<synchronous>, transform_indices = @transform_6, window_bounds = array<i64: 1, 2>}, {pipeline_mode = #tpu.pipeline_mode<synchronous>, transform_indices = @transform_7, window_bounds = array<i64: 1, 256>}]} {
    %c0_i32 = arith.constant 0 : i32
    %0 = arith.cmpi eq, %arg0, %c0_i32 : i32
    %1 = arith.extui %0 : i1 to i32
    %c0_i32_0 = arith.constant 0 : i32
    %2 = arith.cmpi ne, %1, %c0_i32_0 : i32
    scf.if %2 {
      %cst_14 = arith.constant 0.000000e+00 : f32
      %19 = vector.broadcast %cst_14 : f32 to vector<8x256xf32>
      %c0_15 = arith.constant 0 : index
      %c0_16 = arith.constant 0 : index
      %20 = vector.load %arg9[%c0_15, %c0_16] : memref<8x256xf32, #tpu.memory_space<vmem>>, vector<8x256xf32>
      tpu.vector_store %arg9[%c0_15, %c0_16], %19 {strides = array<i32>} : memref<8x256xf32, #tpu.memory_space<vmem>>, vector<8x256xf32>,
    } else {
    }
    %c0 = arith.constant 0 : index
    %c0_1 = arith.constant 0 : index
    %3 = vector.load %arg1[%c0, %c0_1] : memref<64x512xbf16, #tpu.memory_space<vmem>>, vector<64x512xbf16>
    %c0_2 = arith.constant 0 : index
    %c0_3 = arith.constant 0 : index
    %4 = vector.load %arg2[%c0_2, %c0_3] : memref<512x256xbf16, #tpu.memory_space<vmem>>, vector<512x256xbf16>
    %cst = arith.constant dense<0.000000e+00> : vector<64x256xf32>
    %5 = tpu.matmul %3, %4, %cst {dimension_numbers = #tpu.dot_dimension_numbers<[1], [0], [0], [1], [0, 0, 1, 1], [], []>} : vector<64x512xbf16>, vector<512x256xbf16>, vector<64x256xf32> -> vector<64x256xf32>
    %c0_4 = arith.constant 0 : index
    %c0_5 = arith.constant 0 : index
    %6 = vector.load %arg3[%c0_4, %c0_5] : memref<1x256xf32, #tpu.memory_space<vmem>>, vector<1x256xf32>
    %7 = vector.broadcast %6 : vector<1x256xf32> to vector<64x256xf32>
    %8 = arith.addf %5, %7 : vector<64x256xf32>
    %cst_6 = arith.constant 0.000000e+00 : f32
    %9 = vector.broadcast %cst_6 : f32 to vector<64x256xf32>
    %10 = arith.maximumf %8, %9 : vector<64x256xf32>
    %11 = vector.shape_cast %10 : vector<64x256xf32> to vector<8x8x256xf32>
    %c0_7 = arith.constant 0 : index
    %c0_8 = arith.constant 0 : index
    %12 = vector.load %arg9[%c0_7, %c0_8] : memref<8x256xf32, #tpu.memory_space<vmem>>, vector<8x256xf32>
    %cst_9 = arith.constant dense<0.000000e+00> : vector<8x256xf32>
    %13 = vector.multi_reduction <add>, %11, %cst_9 [0] : vector<8x8x256xf32> to vector<8x256xf32>
    %14 = arith.addf %12, %13 : vector<8x256xf32>
    %c0_10 = arith.constant 0 : index
    %c0_11 = arith.constant 0 : index
    %15 = vector.load %arg9[%c0_10, %c0_11] : memref<8x256xf32, #tpu.memory_space<vmem>>, vector<8x256xf32>
    tpu.vector_store %arg9[%c0_10, %c0_11], %14 {strides = array<i32>} : memref<8x256xf32, #tpu.memory_space<vmem>>, vector<8x256xf32>,
    %c0_i32_12 = arith.constant 0 : i32
    %16 = arith.cmpi eq, %arg0, %c0_i32_12 : i32
    %17 = arith.extui %16 : i1 to i32
    %c0_i32_13 = arith.constant 0 : i32
    %18 = arith.cmpi ne, %17, %c0_i32_13 : i32
    scf.if %18 {
      %c0_14 = arith.constant 0 : index
      %c0_15 = arith.constant 0 : index
      %19 = vector.load %arg9[%c0_14, %c0_15] : memref<8x256xf32, #tpu.memory_space<vmem>>, vector<8x256xf32>
      %cst_16 = arith.constant dense<0.000000e+00> : vector<256xf32>
      %20 = vector.multi_reduction <add>, %19, %cst_16 [0] : vector<8x256xf32> to vector<256xf32>
      %21 = vector.shape_cast %20 : vector<256xf32> to vector<1x256xf32>
      %cst_17 = arith.constant 6.400000e+01 : f32
      %22 = vector.broadcast %cst_17 : f32 to vector<1x256xf32>
      %23 = arith.divf %21, %22 : vector<1x256xf32>
      %c0_18 = arith.constant 0 : index
      %c0_19 = arith.constant 0 : index
      %24 = vector.load %arg8[%c0_18, %c0_19] : memref<1x256xf32, #tpu.memory_space<vmem>>, vector<1x256xf32>
      tpu.vector_store %arg8[%c0_18, %c0_19], %23 {strides = array<i32>} : memref<1x256xf32, #tpu.memory_space<vmem>>, vector<1x256xf32>,
      %c0_20 = arith.constant 0 : index
      %c0_21 = arith.constant 0 : index
      %25 = vector.load %arg4[%c0_20, %c0_21] : memref<256x2xf32, #tpu.memory_space<vmem>>, vector<256x2xf32>
      %cst_22 = arith.constant dense<0.000000e+00> : vector<1x2xf32>
      %26 = tpu.matmul %23, %25, %cst_22 {dimension_numbers = #tpu.dot_dimension_numbers<[1], [0], [0], [1], [0, 0, 1, 1], [], []>} : vector<1x256xf32>, vector<256x2xf32>, vector<1x2xf32> -> vector<1x2xf32>
      %c0_23 = arith.constant 0 : index
      %c0_24 = arith.constant 0 : index
      %27 = vector.load %arg5[%c0_23, %c0_24] : memref<1x2xf32, #tpu.memory_space<vmem>>, vector<1x2xf32>
      %28 = arith.addf %26, %27 : vector<1x2xf32>
      %c0_25 = arith.constant 0 : index
      %c0_26 = arith.constant 0 : index
      %29 = vector.load %arg6[%c0_25, %c0_26] : memref<1x2xf32, #tpu.memory_space<vmem>>, vector<1x2xf32>
      tpu.vector_store %arg6[%c0_25, %c0_26], %28 {strides = array<i32>} : memref<1x2xf32, #tpu.memory_space<vmem>>, vector<1x2xf32>,
      %cst_27 = arith.constant dense<0xFF800000> : vector<1xf32>
      %30 = vector.multi_reduction <maximumf>, %28, %cst_27 [1] : vector<1x2xf32> to vector<1xf32>
      %31 = vector.shape_cast %30 : vector<1xf32> to vector<1x1xf32>
      %32 = vector.broadcast %31 : vector<1x1xf32> to vector<1x2xf32>
      %33 = arith.subf %28, %32 : vector<1x2xf32>
      %34 = math.exp %33 : vector<1x2xf32>
      %cst_28 = arith.constant dense<0.000000e+00> : vector<1xf32>
      %35 = vector.multi_reduction <add>, %34, %cst_28 [1] : vector<1x2xf32> to vector<1xf32>
      %36 = vector.shape_cast %35 : vector<1xf32> to vector<1x1xf32>
      %37 = vector.broadcast %36 : vector<1x1xf32> to vector<1x2xf32>
      %38 = arith.divf %34, %37 : vector<1x2xf32>
      %c0_29 = arith.constant 0 : index
      %c0_30 = arith.constant 0 : index
      %39 = vector.load %arg7[%c0_29, %c0_30] : memref<1x2xf32, #tpu.memory_space<vmem>>, vector<1x2xf32>
      tpu.vector_store %arg7[%c0_29, %c0_30], %38 {strides = array<i32>} : memref<1x2xf32, #tpu.memory_space<vmem>>, vector<1x2xf32>,
    } else {
    }
    return
  }
  func.func @transform_0(%arg0: i32) -> (i32, i32) {
    %c0_i32 = arith.constant 0 : i32
    %c0_i32_0 = arith.constant 0 : i32
    return %arg0, %c0_i32 : i32, i32
  }
  func.func @transform_1(%arg0: i32) -> (i32, i32) {
    %c0_i32 = arith.constant 0 : i32
    %c0_i32_0 = arith.constant 0 : i32
    %c0_i32_1 = arith.constant 0 : i32
    return %c0_i32, %c0_i32_0 : i32, i32
  }
  func.func @transform_2(%arg0: i32) -> (i32, i32) {
    %c0_i32 = arith.constant 0 : i32
    %c0_i32_0 = arith.constant 0 : i32
    %c0_i32_1 = arith.constant 0 : i32
    return %c0_i32, %c0_i32_0 : i32, i32
  }
  func.func @transform_3(%arg0: i32) -> (i32, i32) {
    %c0_i32 = arith.constant 0 : i32
    %c0_i32_0 = arith.constant 0 : i32
    %c0_i32_1 = arith.constant 0 : i32
    return %c0_i32, %c0_i32_0 : i32, i32
  }
  func.func @transform_4(%arg0: i32) -> (i32, i32) {
    %c0_i32 = arith.constant 0 : i32
    %c0_i32_0 = arith.constant 0 : i32
    %c0_i32_1 = arith.constant 0 : i32
    return %c0_i32, %c0_i32_0 : i32, i32
  }
  func.func @transform_5(%arg0: i32) -> (i32, i32) {
    %c0_i32 = arith.constant 0 : i32
    %c0_i32_0 = arith.constant 0 : i32
    %c0_i32_1 = arith.constant 0 : i32
    return %c0_i32, %c0_i32_0 : i32, i32
  }
  func.func @transform_6(%arg0: i32) -> (i32, i32) {
    %c0_i32 = arith.constant 0 : i32
    %c0_i32_0 = arith.constant 0 : i32
    %c0_i32_1 = arith.constant 0 : i32
    return %c0_i32, %c0_i32_0 : i32, i32
  }
  func.func @transform_7(%arg0: i32) -> (i32, i32) {
    %c0_i32 = arith.constant 0 : i32
    %c0_i32_0 = arith.constant 0 : i32
    %c0_i32_1 = arith.constant 0 : i32
    return %c0_i32, %c0_i32_0 : i32, i32
  }
}

</mosaic_0001>

<bundles_post_ra>
// kernel: mil_mean_pooling_forward.1
= control target key start
LH: loop header
LB: loop body
LE: loop exit
PB: predicated region body
PF: predicated region fallthrough
CT: control target
= control target key end

     0   :  { %13 = vsyncpa [#allocation4], 0  ;;  %s1608_s0 = inlined_call_operand.vmem [shape: bf16[64,512], index: 0, kind: input, shape index: {}]   ;;  %s1609_s1 = inlined_call_operand.vmem [shape: bf16[512,256], index: 1, kind: input, shape index: {}]   ;;  %s1610_s2 = inlined_call_operand.vmem [shape: f32[1,256], index: 2, kind: input, shape index: {}]   ;;  %s1611_s3 = inlined_call_operand.vmem [shape: f32[256,2], index: 3, kind: input, shape index: {}]   ;;  %s1612_s4 = inlined_call_operand.vmem [shape: f32[1,2], index: 4, kind: input, shape index: {}]   ;;  %s1613_s5 = inlined_call_operand.vmem [shape: f32[1,2], index: 5, kind: output, shape index: {0}]   ;;  %s1614_s6 = inlined_call_operand.hbm [shape: f32[1,2], index: 6, kind: output, shape index: {1}]   ;;  %s1615_s7 = inlined_call_operand.hbm [shape: f32[1,256], index: 7, kind: output, shape index: {2}]  }
   0x1   :  { %v1015_v0 = vld [vmem:[%s1609_s1 + $0x74] ss:$8 sps:$4 sm:$0xff]   ;;  %v1019_v2 = vld [vmem:[%s1609_s1 + $0x70] ss:$8 sps:$4 sm:$0xff]   ;;  %v1021_v4 = vld [vmem:[%s1609_s1 + $0x64] ss:$8 sps:$4 sm:$0xff]  }
   0x2   :  { %v1017_v1 = vld [vmem:[%s1609_s1 + $0x174] ss:$8 sps:$4 sm:$0xff]   ;;  %523 = vmatprep.subr.bf16.mxu0 %v1015_v0  ;;  %v1020_v3 = vld [vmem:[%s1609_s1 + $0x170] ss:$8 sps:$4 sm:$0xff]   ;;  %v1023_v5 = vld [vmem:[%s1609_s1 + $0x164] ss:$8 sps:$4 sm:$0xff]  }
   0x3   :  { %596 = vmatprep.subr.bf16.mxu1 %v1017_v1  ;;  %524 = vmatpush1.bf16.msra.mxu0 %v1019_v2  ;;  %v1025_v6 = vld [vmem:[%s1609_s1 + $0x60] ss:$8 sps:$4 sm:$0xff]   ;;  %v1027_v8 = vld [vmem:[%s1609_s1 + $0x54] ss:$8 sps:$4 sm:$0xff]   ;;  %v1031_v10 = vld [vmem:[%s1609_s1 + $0x50] ss:$8 sps:$4 sm:$0xff]  }
   0x4   :  { %597 = vmatpush1.bf16.msra.mxu1 %v1020_v3  ;;  %525 = vmatprep.subr.bf16.mxu0 %v1021_v4  ;;  %v1026_v7 = vld [vmem:[%s1609_s1 + $0x160] ss:$8 sps:$4 sm:$0xff]   ;;  %v1029_v9 = vld [vmem:[%s1609_s1 + $0x154] ss:$8 sps:$4 sm:$0xff]   ;;  %v1032_v11 = vld [vmem:[%s1609_s1 + $0x150] ss:$8 sps:$4 sm:$0xff]  }
   0x5   :  { %598 = vmatprep.subr.bf16.mxu1 %v1023_v5  ;;  %v1033_v12 = vld [vmem:[%s1609_s1 + $0x44] ss:$8 sps:$4 sm:$0xff]   ;;  %v1037_v14 = vld [vmem:[%s1609_s1 + $0x40] ss:$8 sps:$4 sm:$0xff]   ;;  %v1039_v16 = vld [vmem:[%s1609_s1 + $0x34] ss:$8 sps:$4 sm:$0xff]  }
   0x6   :  { %v1035_v13 = vld [vmem:[%s1609_s1 + $0x144] ss:$8 sps:$4 sm:$0xff]   ;;  %v1038_v15 = vld [vmem:[%s1609_s1 + $0x140] ss:$8 sps:$4 sm:$0xff]   ;;  %v1041_v17 = vld [vmem:[%s1609_s1 + $0x134] ss:$8 sps:$4 sm:$0xff]  }
   0x7   :  { %526 = vmatpush1.bf16.msra.mxu0 %v1025_v6  ;;  %v1043_v18 = vld [vmem:[%s1609_s1 + $0x30] ss:$8 sps:$4 sm:$0xff]   ;;  %v1045_v20 = vld [vmem:[%s1609_s1 + $0x24] ss:$8 sps:$4 sm:$0xff]   ;;  %v1049_v22 = vld [vmem:[%s1609_s1 + $0x20] ss:$8 sps:$4 sm:$0xff]  }
   0x8   :  { %599 = vmatpush1.bf16.msra.mxu1 %v1026_v7  ;;  %527 = vmatprep.subr.bf16.mxu0 %v1027_v8  ;;  %v1044_v19 = vld [vmem:[%s1609_s1 + $0x130] ss:$8 sps:$4 sm:$0xff]   ;;  %v1047_v21 = vld [vmem:[%s1609_s1 + $0x124] ss:$8 sps:$4 sm:$0xff]   ;;  %v1050_v23 = vld [vmem:[%s1609_s1 + $0x120] ss:$8 sps:$4 sm:$0xff]  }
   0x9   :  { %600 = vmatprep.subr.bf16.mxu1 %v1029_v9  ;;  %v1051_v24 = vld [vmem:[%s1609_s1 + $0x14] ss:$8 sps:$4 sm:$0xff]   ;;  %v1055_v26 = vld [vmem:[%s1609_s1 + $0x10] ss:$8 sps:$4 sm:$0xff]   ;;  %v1057_v28 = vld [vmem:[%s1609_s1 + $0x4] ss:$8 sps:$4 sm:$0xff]  }
   0xa   :  { %v1053_v25 = vld [vmem:[%s1609_s1 + $0x114] ss:$8 sps:$4 sm:$0xff]   ;;  %v1056_v27 = vld [vmem:[%s1609_s1 + $0x110] ss:$8 sps:$4 sm:$0xff]   ;;  %v1059_v29 = vld [vmem:[%s1609_s1 + $0x104] ss:$8 sps:$4 sm:$0xff]  }
   0xb   :  { %528 = vmatpush1.bf16.msra.mxu0 %v1031_v10  ;;  %v1061_v30 = vld [vmem:[%s1609_s1] ss:$8 sps:$4 sm:$0xff]   ;;  %v1063_v32 = vld [vmem:[%s1609_s1 + $0xf4] ss:$8 sps:$4 sm:$0xff]   ;;  %v1067_v34 = vld [vmem:[%s1609_s1 + $0xf0] ss:$8 sps:$4 sm:$0xff]  }
   0xc   :  { %601 = vmatpush1.bf16.msra.mxu1 %v1032_v11  ;;  %529 = vmatprep.subr.bf16.mxu0 %v1033_v12  ;;  %v1062_v31 = vld [vmem:[%s1609_s1 + $0x100] ss:$8 sps:$4 sm:$0xff]   ;;  %v1065_v33 = vld [vmem:[%s1609_s1 + $0x1f4] ss:$8 sps:$4 sm:$0xff]   ;;  %v1068_v35 = vld [vmem:[%s1609_s1 + $0x1f0] ss:$8 sps:$4 sm:$0xff]  }
   0xd   :  { %602 = vmatprep.subr.bf16.mxu1 %v1035_v13  ;;  %v1069_v36 = vld [vmem:[%s1609_s1 + $0xe4] ss:$8 sps:$4 sm:$0xff]   ;;  %v1073_v38 = vld [vmem:[%s1609_s1 + $0xe0] ss:$8 sps:$4 sm:$0xff]   ;;  %v1075_v40 = vld [vmem:[%s1609_s1 + $0xd4] ss:$8 sps:$4 sm:$0xff]  }
   0xe   :  { %v1071_v37 = vld [vmem:[%s1609_s1 + $0x1e4] ss:$8 sps:$4 sm:$0xff]   ;;  %v1074_v39 = vld [vmem:[%s1609_s1 + $0x1e0] ss:$8 sps:$4 sm:$0xff]   ;;  %v1077_v41 = vld [vmem:[%s1609_s1 + $0x1d4] ss:$8 sps:$4 sm:$0xff]  }
   0xf   :  { %530 = vmatpush1.bf16.msra.mxu0 %v1037_v14  ;;  %v1079_v42 = vld [vmem:[%s1609_s1 + $0xd0] ss:$8 sps:$4 sm:$0xff]   ;;  %v1081_v44 = vld [vmem:[%s1609_s1 + $0xc4] ss:$8 sps:$4 sm:$0xff]   ;;  %v1085_v46 = vld [vmem:[%s1609_s1 + $0xc0] ss:$8 sps:$4 sm:$0xff]  }
  0x10   :  { %603 = vmatpush1.bf16.msra.mxu1 %v1038_v15  ;;  %531 = vmatprep.subr.bf16.mxu0 %v1039_v16  ;;  %v1080_v43 = vld [vmem:[%s1609_s1 + $0x1d0] ss:$8 sps:$4 sm:$0xff]   ;;  %v1083_v45 = vld [vmem:[%s1609_s1 + $0x1c4] ss:$8 sps:$4 sm:$0xff]   ;;  %v1086_v47 = vld [vmem:[%s1609_s1 + $0x1c0] ss:$8 sps:$4 sm:$0xff]  }
  0x11   :  { %604 = vmatprep.subr.bf16.mxu1 %v1041_v17  ;;  %v1087_v48 = vld [vmem:[%s1609_s1 + $0xb4] ss:$8 sps:$4 sm:$0xff]   ;;  %v1091_v52 = vld [vmem:[%s1609_s1 + $0xb0] ss:$8 sps:$4 sm:$0xff]   ;;  %v1093_v54 = vld [vmem:[%s1609_s1 + $0xa4] ss:$8 sps:$4 sm:$0xff]  }
  0x12   :  { %v1113_v49 = vld [vmem:[%s1608_s0 + $0x4] ss:$16 sps:$4 sm:$0xff]   ;;  %v1116_v51 = vld [vmem:[%s1608_s0 + $0xc] ss:$16 sps:$4 sm:$0xff]   ;;  %v1092_v53 = vld [vmem:[%s1609_s1 + $0x1b0] ss:$8 sps:$4 sm:$0xff]  }
  0x13   :  { %532 = vmatpush1.bf16.msra.mxu0 %v1043_v18  ;;  %v1089_v50 = vld [vmem:[%s1609_s1 + $0x1b4] ss:$8 sps:$4 sm:$0xff]   ;;  %555 = vmatprep.mubr.bf16.mxu0 %v1113_v49  ;;  %v1095_v55 = vld [vmem:[%s1609_s1 + $0x1a4] ss:$8 sps:$4 sm:$0xff]   ;;  %v1097_v56 = vld [vmem:[%s1609_s1 + $0xa0] ss:$8 sps:$4 sm:$0xff]  }
  0x14   :  { %605 = vmatpush1.bf16.msra.mxu1 %v1044_v19  ;;  %533 = vmatprep.subr.bf16.mxu0 %v1045_v20  ;;  %v1098_v57 = vld [vmem:[%s1609_s1 + $0x1a0] ss:$8 sps:$4 sm:$0xff]   ;;  %v1099_v58 = vld [vmem:[%s1609_s1 + $0x94] ss:$8 sps:$4 sm:$0xff]  }
  0x15   :  { %606 = vmatprep.subr.bf16.mxu1 %v1047_v21  ;;  %628 = vmatprep.mubr.bf16.mxu1 %v1116_v51  ;;  %v1101_v59 = vld [vmem:[%s1609_s1 + $0x194] ss:$8 sps:$4 sm:$0xff]  }
  0x17   :  { %534 = vmatpush1.bf16.msra.mxu0 %v1049_v22 }
  0x18   :  { %607 = vmatpush1.bf16.msra.mxu1 %v1050_v23  ;;  %535 = vmatprep.subr.bf16.mxu0 %v1051_v24 }
  0x19   :  { %608 = vmatprep.subr.bf16.mxu1 %v1053_v25 }
  0x1b   :  { %536 = vmatpush1.bf16.msra.mxu0 %v1055_v26 }
  0x1c   :  { %609 = vmatpush1.bf16.msra.mxu1 %v1056_v27  ;;  %537 = vmatprep.subr.bf16.mxu0 %v1057_v28 }
  0x1d   :  { %610 = vmatprep.subr.bf16.mxu1 %v1059_v29 }
  0x1f   :  { %538 = vmatpush1.bf16.msra.mxu0 %v1061_v30 }
  0x20   :  { %611 = vmatpush1.bf16.msra.mxu1 %v1062_v31  ;;  %539 = vmatprep.subr.bf16.mxu0 %v1063_v32 }
  0x21   :  { %612 = vmatprep.subr.bf16.mxu1 %v1065_v33 }
  0x23   :  { %540 = vmatpush2.bf16.msra.mxu0 %v1067_v34 }
  0x24   :  { %613 = vmatpush2.bf16.msra.mxu1 %v1068_v35  ;;  %541 = vmatprep.subr.bf16.mxu0 %v1069_v36 }
  0x25   :  { %614 = vmatprep.subr.bf16.mxu1 %v1071_v37 }
  0x27   :  { %542 = vmatpush2.bf16.msra.mxu0 %v1073_v38 }
  0x28   :  { %615 = vmatpush2.bf16.msra.mxu1 %v1074_v39  ;;  %543 = vmatprep.subr.bf16.mxu0 %v1075_v40 }
  0x29   :  { %616 = vmatprep.subr.bf16.mxu1 %v1077_v41 }
  0x2b   :  { %544 = vmatpush2.bf16.msra.mxu0 %v1079_v42 }
  0x2c   :  { %617 = vmatpush2.bf16.msra.mxu1 %v1080_v43  ;;  %545 = vmatprep.subr.bf16.mxu0 %v1081_v44 }
  0x2d   :  { %618 = vmatprep.subr.bf16.mxu1 %v1083_v45 }
  0x2f   :  { %546 = vmatpush2.bf16.msra.mxu0 %v1085_v46 }
  0x30   :  { %619 = vmatpush2.bf16.msra.mxu1 %v1086_v47  ;;  %547 = vmatprep.subr.bf16.mxu0 %v1087_v48 }
  0x31   :  { %620 = vmatprep.subr.bf16.mxu1 %v1089_v50 }
  0x33   :  { %548 = vmatpush2.bf16.msra.mxu0 %v1091_v52 }
  0x34   :  { %621 = vmatpush2.bf16.msra.mxu1 %v1092_v53  ;;  %549 = vmatprep.subr.bf16.mxu0 %v1093_v54 }
  0x35   :  { %622 = vmatprep.subr.bf16.mxu1 %v1095_v55 }
  0x36   :  { %14 = vsyncpa [#allocation6], 0  ;;  %v1103_v60 = vld [vmem:[%s1609_s1 + $0x90] ss:$8 sps:$4 sm:$0xff]   ;;  %v1105_v62 = vld [vmem:[%s1609_s1 + $0x84] ss:$8 sps:$4 sm:$0xff]   ;;  %v113_v48 = vlaneseq }
  0x37   :  { %550 = vmatpush2.bf16.msra.mxu0 %v1097_v56  ;;  %v1104_v61 = vld [vmem:[%s1609_s1 + $0x190] ss:$8 sps:$4 sm:$0xff]   ;;  %v1107_v63 = vld [vmem:[%s1609_s1 + $0x184] ss:$8 sps:$4 sm:$0xff]   ;;  %v1109_v0 = vld [vmem:[%s1609_s1 + $0x80] ss:$8 sps:$4 sm:$0xff]  }
  0x38   :  { %623 = vmatpush2.bf16.msra.mxu1 %v1098_v57  ;;  %551 = vmatprep.subr.bf16.mxu0 %v1099_v58  ;;  %v1110_v1 = vld [vmem:[%s1609_s1 + $0x180] ss:$8 sps:$4 sm:$0xff]   ;;  %v1117_v4 = vld [vmem:[%s1608_s0 + $0x24] ss:$16 sps:$4 sm:$0xff]   ;;  %v1119_v5 = vld [vmem:[%s1608_s0 + $0x2c] ss:$16 sps:$4 sm:$0xff]  }
  0x39   :  { %624 = vmatprep.subr.bf16.mxu1 %v1101_v59  ;;  %v1111_v2 = vld [vmem:[%s1608_s0] ss:$16 sps:$4 sm:$0xff]   ;;  %v1114_v3 = vld [vmem:[%s1608_s0 + $0x8] ss:$16 sps:$4 sm:$0xff]   ;;  %v1123_v8 = vld [vmem:[%s1608_s0 + $0x44] ss:$16 sps:$4 sm:$0xff]  }
  0x3a   :  { %v1121_v6 = vld [vmem:[%s1608_s0 + $0x20] ss:$16 sps:$4 sm:$0xff]   ;;  %v1122_v7 = vld [vmem:[%s1608_s0 + $0x28] ss:$16 sps:$4 sm:$0xff]   ;;  %v1125_v9 = vld [vmem:[%s1608_s0 + $0x4c] ss:$16 sps:$4 sm:$0xff]  }
  0x3b   :  { %552 = vmatpush2.bf16.msra.mxu0 %v1103_v60  ;;  %v1127_v10 = vld [vmem:[%s1608_s0 + $0x40] ss:$16 sps:$4 sm:$0xff]   ;;  %v1128_v11 = vld [vmem:[%s1608_s0 + $0x48] ss:$16 sps:$4 sm:$0xff]   ;;  %v1129_v12 = vld [vmem:[%s1608_s0 + $0x64] ss:$16 sps:$4 sm:$0xff]  }
  0x3c   :  { %625 = vmatpush2.bf16.msra.mxu1 %v1104_v61  ;;  %553 = vmatprep.subr.bf16.mxu0 %v1105_v62  ;;  %v1131_v13 = vld [vmem:[%s1608_s0 + $0x6c] ss:$16 sps:$4 sm:$0xff]   ;;  %v1133_v14 = vld [vmem:[%s1608_s0 + $0x60] ss:$16 sps:$4 sm:$0xff]   ;;  %v1134_v15 = vld [vmem:[%s1608_s0 + $0x68] ss:$16 sps:$4 sm:$0xff]  }
  0x3d   :  { %626 = vmatprep.subr.bf16.mxu1 %v1107_v63  ;;  %v779_v16 = vld [vmem:[%s1611_s3 + $0xf8] sm:$0xff]  ;;  %v778_v18 = vld [vmem:[%s1611_s3 + $0xf0] sm:$0xff]  ;;  %v777_v20 = vld [vmem:[%s1611_s3 + $0xe8] sm:$0xff]  ;;  %v1563_v49 = vshrl.u32 %v113_v48, 7  ;;  %vm745_vm0 = vcmp.lt.s32.totalorder %v113_v48, 256  ;;  %vm851_vm1 = vcmask 8192  }
  0x3e   :  { %v763_v17 = vld [vmem:[%s1611_s3 + $0x78] sm:$0xff]  ;;  %v762_v19 = vld [vmem:[%s1611_s3 + $0x70] sm:$0xff]  ;;  %v761_v21 = vld [vmem:[%s1611_s3 + $0x68] sm:$0xff] }
  0x3f   :  { %554 = vmatpush2.bf16.msra.mxu0 %v1109_v0  ;;  %v776_v22 = vld [vmem:[%s1611_s3 + $0xe0] sm:$0xff]  ;;  %v775_v24 = vld [vmem:[%s1611_s3 + $0xd8] sm:$0xff]  ;;  %v774_v26 = vld [vmem:[%s1611_s3 + $0xd0] sm:$0xff]  ;;  %v115_v54 = vsub.s32 0, %v1563_v49  ;;  %v119_v58 = vsub.s32 1, %v1563_v49 }
  0x40   :  { %627 = vmatpush2.bf16.msra.mxu1 %v1110_v1  ;;  %977 = vmatprep.subr.mxu0 %v779_v16  ;;  %v760_v23 = vld [vmem:[%s1611_s3 + $0x60] sm:$0xff]  ;;  %v759_v25 = vld [vmem:[%s1611_s3 + $0x58] sm:$0xff]  ;;  %v758_v27 = vld [vmem:[%s1611_s3 + $0x50] sm:$0xff] }
  0x41   :  { %v773_v28 = vld [vmem:[%s1611_s3 + $0xc8] sm:$0xff]  ;;  %v772_v30 = vld [vmem:[%s1611_s3 + $0xc0] sm:$0xff]  ;;  %v771_v32 = vld [vmem:[%s1611_s3 + $0xb8] sm:$0xff] }
  0x42   :  { %556 = vmatmul.mubr.bf16.vlgmr.msra.gmra.mxu0 %v1111_v2  ;;  %v757_v29 = vld [vmem:[%s1611_s3 + $0x48] sm:$0xff]  ;;  %v756_v31 = vld [vmem:[%s1611_s3 + $0x40] sm:$0xff]  ;;  %v755_v33 = vld [vmem:[%s1611_s3 + $0x38] sm:$0xff] }
  0x43   :  { %629 = vmatmul.mubr.bf16.vlgmr.msra.gmra.mxu1 %v1114_v3  ;;  %565 = vmatprep.mubr.bf16.mxu0 %v1117_v4  ;;  %v770_v34 = vld [vmem:[%s1611_s3 + $0xb0] sm:$0xff]  ;;  %v769_v36 = vld [vmem:[%s1611_s3 + $0xa8] sm:$0xff]  ;;  %v768_v38 = vld [vmem:[%s1611_s3 + $0xa0] sm:$0xff] }
  0x44   :  { %638 = vmatprep.mubr.bf16.mxu1 %v1119_v5  ;;  %978 = vmatpush3.msra.mxu0 %v763_v17  ;;  %v754_v35 = vld [vmem:[%s1611_s3 + $0x30] sm:$0xff]  ;;  %v753_v37 = vld [vmem:[%s1611_s3 + $0x28] sm:$0xff]  ;;  %v752_v39 = vld [vmem:[%s1611_s3 + $0x20] sm:$0xff] }
  0x45   :  { %979 = vmatprep.subr.mxu0 %v778_v18  ;;  %v767_v40 = vld [vmem:[%s1611_s3 + $0x98] sm:$0xff]  ;;  %v766_v42 = vld [vmem:[%s1611_s3 + $0x90] sm:$0xff]  ;;  %v765_v44 = vld [vmem:[%s1611_s3 + $0x88] sm:$0xff] }
  0x46   :  { %980 = vmatpush3.msra.mxu0 %v762_v19  ;;  %v751_v41 = vld [vmem:[%s1611_s3 + $0x18] sm:$0xff]  ;;  %v750_v43 = vld [vmem:[%s1611_s3 + $0x10] sm:$0xff]  ;;  %v749_v45 = vld [vmem:[%s1611_s3 + $0x8] sm:$0xff] }
  0x47   :  { %981 = vmatprep.subr.mxu0 %v777_v20  ;;  %v764_v46 = vld [vmem:[%s1611_s3 + $0x80] sm:$0xff] }
  0x48   :  { %982 = vmatpush3.msra.mxu0 %v761_v21  ;;  %v748_v47 = vld [vmem:[%s1611_s3] sm:$0xff] }
  0x49   :  { %983 = vmatprep.subr.mxu0 %v776_v22  ;;  %v111_v55 = vld [vmem:[%s1610_s2] sm:$0x3] }
  0x4a   :  { %566 = vmatmul.mubr.bf16.gmra.mxu0 %v1121_v6  ;;  %v1570_v61 = vrot.slane %v111_v55, %v115_v54  ;;  %v1572_v0 = vrot.slane %v111_v55, %v119_v58 }
  0x4b   :  { %639 = vmatmul.mubr.bf16.gmra.mxu1 %v1122_v7  ;;  %575 = vmatprep.mubr.bf16.mxu0 %v1123_v8 }
  0x4c   :  { %648 = vmatprep.mubr.bf16.mxu1 %v1125_v9  ;;  %984 = vmatpush3.msra.mxu0 %v760_v23 }
  0x4d   :  { %985 = vmatprep.subr.mxu0 %v775_v24 }
  0x4e   :  { %986 = vmatpush3.msra.mxu0 %v759_v25 }
  0x4f   :  { %987 = vmatprep.subr.mxu0 %v774_v26 }
  0x50   :  { %988 = vmatpush3.msra.mxu0 %v758_v27 }
  0x51   :  { %989 = vmatprep.subr.mxu0 %v773_v28 }
  0x52   :  { %576 = vmatmul.mubr.bf16.gmra.mxu0 %v1127_v10 }
  0x53   :  { %649 = vmatmul.mubr.bf16.gmra.mxu1 %v1128_v11  ;;  %585 = vmatprep.mubr.bf16.mxu0 %v1129_v12 }
  0x54   :  { %658 = vmatprep.mubr.bf16.mxu1 %v1131_v13  ;;  %990 = vmatpush3.msra.mxu0 %v757_v29 }
  0x55   :  { %991 = vmatprep.subr.mxu0 %v772_v30 }
  0x56   :  { %992 = vmatpush3.msra.mxu0 %v756_v31 }
  0x57   :  { %993 = vmatprep.subr.mxu0 %v771_v32 }
  0x58   :  { %994 = vmatpush3.msra.mxu0 %v755_v33 }
  0x59   :  { %995 = vmatprep.subr.mxu0 %v770_v34 }
  0x5a   :  { %586 = vmatmul.mubr.bf16.gmra.mxu0 %v1133_v14 }
  0x5b   :  { %659 = vmatmul.mubr.bf16.gmra.mxu1 %v1134_v15  ;;  %996 = vmatpush3.msra.mxu0 %v754_v35 }
  0x5c   :  { %997 = vmatprep.subr.mxu0 %v769_v36 }
  0x5d   :  { %998 = vmatpush3.msra.mxu0 %v753_v37 }
  0x5e   :  { %999 = vmatprep.subr.mxu0 %v768_v38 }
  0x5f   :  { %1000 = vmatpush3.msra.mxu0 %v752_v39 }
  0x60   :  { %1001 = vmatprep.subr.mxu0 %v767_v40 }
  0x61   :  { %1002 = vmatpush3.msra.mxu0 %v751_v41 }
  0x62   :  { %1003 = vmatprep.subr.mxu0 %v766_v42 }
  0x63   :  { %1004 = vmatpush3.msra.mxu0 %v750_v43 }
  0x64   :  { %1005 = vmatprep.subr.mxu0 %v765_v44 }
  0x65   :  { %1006 = vmatpush3.msra.mxu0 %v749_v45 }
  0x66   :  { %1007 = vmatprep.subr.mxu0 %v764_v46 }
  0x67   :  { %1008 = vmatpush3.msra.mxu0 %v748_v47 }
 0x102   :  { %v557_v50 = vpop.f32.mrf.mxu0 }
 0x103   :  { %v630_v51 = vpop.f32.mrf.mxu1  ;;  %v558_v4 = vadd.f32 %v557_v50, %v1570_v61 }
 0x104   :  { %v559_v52 = vpop.f32.mrf.mxu0 }
 0x105   :  { %v632_v53 = vpop.f32.mrf.mxu1  ;;  %v560_v9 = vadd.f32 %v559_v52, %v1572_v0  ;;  %v631_v15 = vadd.f32 %v630_v51, %v558_v4 }
 0x106   :  { %v561_v56 = vpop.f32.mrf.mxu0 }
 0x107   :  { %v634_v57 = vpop.f32.mrf.mxu1  ;;  %v562_v1 = vadd.f32 %v561_v56, %v1570_v61  ;;  %v633_v21 = vadd.f32 %v632_v53, %v560_v9  ;;  %v669_v28 = vmax.f32 %v631_v15, 0.0 }
 0x108   :  { %v563_v59 = vpop.f32.mrf.mxu0 }
 0x109   :  { %v636_v60 = vpop.f32.mrf.mxu1  ;;  %v564_v5 = vadd.f32 %v563_v59, %v1572_v0  ;;  %v635_v10 = vadd.f32 %v634_v57, %v562_v1  ;;  %v670_v36 = vmax.f32 %v633_v21, 0.0 }
 0x10a   :  { %v567_v62 = vpop.f32.mrf.mxu0 }
 0x10b   :  { %v640_v63 = vpop.f32.mrf.mxu1  ;;  %v568_v6 = vadd.f32 %v567_v62, %v1570_v61  ;;  %v637_v16 = vadd.f32 %v636_v60, %v564_v5  ;;  %v671_v23 = vmax.f32 %v635_v10, 0.0 }
 0x10c   :  { %v569_v2 = vpop.f32.mrf.mxu0 }
 0x10d   :  { %v642_v3 = vpop.f32.mrf.mxu1  ;;  %v570_v11 = vadd.f32 %v569_v2, %v1572_v0  ;;  %v641_v17 = vadd.f32 %v640_v63, %v568_v6  ;;  %v672_v30 = vmax.f32 %v637_v16, 0.0  ;;  %v687_v38 = vadd.f32 %v671_v23, %v669_v28 }
 0x10e   :  { %v571_v7 = vpop.f32.mrf.mxu0 }
 0x10f   :  { %v644_v8 = vpop.f32.mrf.mxu1  ;;  %v572_v12 = vadd.f32 %v571_v7, %v1570_v61  ;;  %v643_v24 = vadd.f32 %v642_v3, %v570_v11  ;;  %v673_v31 = vmax.f32 %v641_v17, 0.0  ;;  %v694_v46 = vadd.f32 %v672_v30, %v670_v36 }
 0x110   :  { %v573_v13 = vpop.f32.mrf.mxu0 }
 0x111   :  { %v646_v14 = vpop.f32.mrf.mxu1  ;;  %v574_v18 = vadd.f32 %v573_v13, %v1572_v0  ;;  %v645_v25 = vadd.f32 %v644_v8, %v572_v12  ;;  %v674_v39 = vmax.f32 %v643_v24, 0.0  ;;  %v688_v47 = vadd.f32 %v687_v38, %v673_v31 }
 0x112   :  { %v577_v19 = vpop.f32.mrf.mxu0  ;;  %v1183_v31 = vmov 1966171168  }
 0x113   :  { %v650_v20 = vpop.f32.mrf.mxu1  ;;  %v578_v22 = vadd.f32 %v577_v19, %v1570_v61  ;;  %v647_v32 = vadd.f32 %v646_v14, %v574_v18  ;;  %v675_v40 = vmax.f32 %v645_v25, 0.0  ;;  %v695_v56 = vadd.f32 %v694_v46, %v674_v39 }
 0x114   :  { %v579_v26 = vpop.f32.mrf.mxu0 }
 0x115   :  { %v652_v27 = vpop.f32.mrf.mxu1  ;;  %v580_v29 = vadd.f32 %v579_v26, %v1572_v0  ;;  %v651_v33 = vadd.f32 %v650_v20, %v578_v22  ;;  %v676_v50 = vmax.f32 %v647_v32, 0.0  ;;  %v689_v57 = vadd.f32 %v688_v47, %v675_v40 }
 0x116   :  { %v581_v34 = vpop.f32.mrf.mxu0  ;;  %v729_v32 = vunpack.c.l.s4 %v1183_v31 }
 0x117   :  { %v654_v35 = vpop.f32.mrf.mxu1  ;;  %v582_v37 = vadd.f32 %v581_v34, %v1570_v61  ;;  %v653_v41 = vadd.f32 %v652_v27, %v580_v29  ;;  %v677_v51 = vmax.f32 %v651_v33, 0.0  ;;  %v696_v2 = vadd.f32 %v695_v56, %v676_v50 }
 0x118   :  { %v583_v42 = vpop.f32.mrf.mxu0  ;;  %v730_v36 = vunpack.c.0.s8 %v729_v32 }
 0x119   :  { %v656_v43 = vpop.f32.mrf.mxu1  ;;  %v655_v44 = vadd.f32 %v654_v35, %v582_v37  ;;  %v584_v45 = vadd.f32 %v583_v42, %v1572_v0  ;;  %v678_v58 = vmax.f32 %v653_v41, 0.0  ;;  %v690_v3 = vadd.f32 %v689_v57, %v677_v51 }
 0x11a   :  { %v587_v52 = vpop.f32.mrf.mxu0  ;;  %v733_v40 = vsub.s32 %v730_v36, %v1563_v49 }
 0x11b   :  { %v660_v53 = vpop.f32.mrf.mxu1  ;;  %v657_v54 = vadd.f32 %v656_v43, %v584_v45  ;;  %v588_v55 = vadd.f32 %v587_v52, %v1570_v61  ;;  %v679_v62 = vmax.f32 %v655_v44, 0.0  ;;  %v697_v10 = vadd.f32 %v696_v2, %v678_v58  ;;  %v780_v45 = vld [vmem:[%s1612_s4] sm:$0x1]  ;;  %s1184_s4 = smov [#allocation5]  }
 0x11c   :  { %v589_v59 = vpop.f32.mrf.mxu0  ;;  %s883_s15 = sshll.u32 %s1184_s4, 4  ;;  %s884_s15 = int_to_ptr.vmem [resolvable:$true] %s883_s15 }
 0x11d   :  { %v662_v60 = vpop.f32.mrf.mxu1  ;;  %v661_v63 = vadd.f32 %v660_v53, %v588_v55  ;;  %v590_v1 = vadd.f32 %v589_v59, %v1572_v0  ;;  %v680_v6 = vmax.f32 %v657_v54, 0.0  ;;  %v691_v12 = vadd.f32 %v690_v3, %v679_v62  ;;  %s1139_s16 = scalar_lea.vmem %s884_s15, 32  ;;  %p1144_p1 = scmp.lt.s32.totalorder %s884_s15, %s884_s15 }
 0x11e   :  { %v591_v4 = vpop.f32.mrf.mxu0  ;;  %p1140_p0 = scmp.ne.s32.totalorder %s884_s15, %s1139_s16  ;;  %p1145_p2 = scmp.lt.s32.totalorder %s1139_s16, %s1139_s16 }
 0x11f   :  { %v664_v5 = vpop.f32.mrf.mxu1  ;;  %v681_v7 = vmax.f32 %v661_v63, 0.0  ;;  %v663_v8 = vadd.f32 %v662_v60, %v590_v1  ;;  %v592_v9 = vadd.f32 %v591_v4, %v1570_v61  ;;  %v698_v17 = vadd.f32 %v697_v10, %v680_v6 }
 0x120   :  { %v593_v11 = vpop.f32.mrf.mxu0  ;;  %p1146_p3 = por %p1145_p2, %p1144_p1 }
 0x121   :  { %v682_v13 = vmax.f32 %v663_v8, 0.0  ;;  %v665_v14 = vadd.f32 %v664_v5, %v592_v9  ;;  %v594_v15 = vadd.f32 %v593_v11, %v1572_v0  ;;  %v666_v16 = vpop.f32.mrf.mxu1  ;;  %v692_v18 = vadd.f32 %v691_v12, %v681_v7 }
 0x122   :  { %p1147_p4 = pnand %p1146_p3, %p1140_p0 }
 0x123   :  { %v683_v19 = vmax.f32 %v665_v14, 0.0  ;;  %v667_v20 = vadd.f32 %v666_v16, %v594_v15  ;;  %v699_v21 = vadd.f32 %v698_v17, %v682_v13 }
 0x125   :  { %v693_v22 = vadd.f32 %v692_v18, %v683_v19  ;;  %v684_v23 = vmax.f32 %v667_v20, 0.0 }
 0x127   :  { %v710_v24 = vrot.slane %v693_v22, 4  ;;  %v700_v25 = vadd.f32 %v699_v21, %v684_v23 }
 0x129   :  { %v711_v26 = vadd.f32 %v710_v24, %v693_v22  ;;  %v716_v27 = vrot.slane %v700_v25, 4 }
 0x12b   :  { %v712_v61 = vrot.slane %v711_v26, 2  ;;  %v717_v28 = vadd.f32 %v716_v27, %v700_v25 }
 0x12d   :  { %v713_v29 = vadd.f32 %v712_v61, %v711_v26  ;;  %v718_v30 = vrot.slane %v717_v28, 2 }
 0x12f   :  { %v714_v33 = vrot.slane %v713_v29, 1  ;;  %v719_v0 = vadd.f32 %v718_v30, %v717_v28 }
 0x131   :  { %v715_v34 = vadd.f32 %v714_v33, %v713_v29  ;;  %v720_v35 = vrot.slane %v719_v0, 1 }
 0x133   :  { %v721_v37 = vadd.f32 %v720_v35, %v719_v0  ;;  %v723_v38 = vmul.f32 0.015625, %v715_v34 }
 0x135   :  { %v724_v39 = vmul.f32 0.015625, %v721_v37 }
 0x137   :  { %v727_v41 = vcombine.low %v723_v38, %v724_v39  ;;  %845 = vmatprep.mubr.f32.mxu0 %v724_v39 }
 0x138   :  { %846 = vmatmul.mubr.f32.vlgmr.msra.gmra.mxu0 %v723_v38 }
 0x139   :  { %v734_v42 = vrot.slane %v727_v41, %v733_v40 }
 0x13b   :  { %v741_v43 = vrot.slane %v734_v42, %v733_v40 }
 0x13d   :  { %747 = vst.msk [vmem:[#allocation5] sm:$0x3] %vm745_vm0, %v741_v43 }
 0x1f8   :  { %v1009_v44 = vpop.f32.mrf.mxu0 }
 0x1fa   :  { %v1010_v46 = vpop.f32.mrf.mxu0 }
 0x1fb   :  { %v1011_v47 = vadd.f32 %v1010_v46, %v1009_v44 }
 0x1fd   :  { %v848_v50 = vadd.f32 %v1011_v47, %v780_v45 }
 0x1ff   :  { %v853_v51 = vsel %vm851_vm1, %v848_v50, -inf  ;;  %852 = vst.msk [vmem:[%s1613_s5] sm:$0x1] %vm851_vm1, %v848_v50 }
 0x200   :  { %854 = vmax.xlane.f32.xlu0 %v853_v51 }
 0x289   :  { %v855_v48 = vpop.xlane.xlu0 %854 }
 0x28a   :  { %v856_v49 = vsub.f32 %v848_v50, %v855_v48 }
 0x28c   :  { %v857_v52 = vmul.f32 1.442695, %v856_v49 }
 0x28e   :  { %1135 = vpow2.f32 %v857_v52 }
 0x29b   :  { %v1136_v53 = vpop.eup %1135 }
 0x29c   :  { %v859_v54 = vsel %vm851_vm1, %v1136_v53, 0.0 }
 0x29d   :  { %860 = vadd.xlane.f32.xlu0 %v859_v54 }
 0x29e   :  { %1150 = shalt.err (!%p1147_p4)
}
 0x29f   :  { %886 = dma.vmem_to_hbm [thread:$0]  %s884_s15, 32, %s1615_s7, [#allocation6]  }
 0x2a0   :  { %s1185_s18 = smov [#allocation3]  }
 0x2a1   :  { %s873_s19 = sshll.u32 %s1185_s18, 4  ;;  %s874_s19 = int_to_ptr.vmem [resolvable:$true] %s873_s19 }
 0x2a2   :  { %s1159_s20 = scalar_lea.vmem %s874_s19, 16  ;;  %s1163_s21 = scalar_lea.vmem %s874_s19, 32 }
 0x2a3   :  { %p1160_p5 = scmp.ne.s32.totalorder %s874_s19, %s1159_s20  ;;  %p1164_p6 = scmp.lt.s32.totalorder %s874_s19, %s874_s19 }
 0x2a4   :  { %p1165_p7 = scmp.lt.s32.totalorder %s1163_s21, %s1159_s20 }
 0x2a6   :  { %p1166_p8 = por %p1165_p7, %p1164_p6 }
 0x2a8   :  { %p1167_p9 = pnand %p1166_p8, %p1160_p5 }
 0x326   :  { %v861_v55 = vpop.xlane.xlu0 %860 }
 0x327   :  { %1137 = vrcp.f32 %v861_v55 }
 0x334   :  { %v1138_v56 = vpop.eup %1137 }
 0x335   :  { %v863_v57 = vmul.f32 %v1138_v56, %v1136_v53 }
 0x337   :  { %864 = vst.msk [vmem:[#allocation3] sm:$0x1] %vm851_vm1, %v863_v57 }
 0x338   :  { %1170 = shalt.err (!%p1167_p9)
}
 0x339   :  { %876 = dma.vmem_to_hbm [thread:$0]  %s874_s19, 16, %s1614_s6, [#allocation4]  }
 0x33a   :  { %1179 = dma.done.wait [#allocation4], 16  }
 0x33b   :  { %1180 = vsyncadd [#allocation4], 4294967280 }
 0x33c   :  { %1181 = dma.done.wait [#allocation6], 32  }
 0x33d   :  { %1182 = vsyncadd [#allocation6], 4294967264 }
 0x33e   :  { %895 = vsyncpa [#allocation4], 1 }
 0x33f   :  { %896 = vsyncpa [#allocation6], 1 }

</bundles_post_ra>
